<compile_context>
chip_gen: v7x
topology: tpu7x:2x2x1
jax: 0.10.0
libtpu: 0.0.40
codegen_flags: <defaults>
</compile_context>

<pallas_src>
import jax
import jax.numpy as jnp
from jax.experimental import pallas as pl
from jax.experimental.pallas import tpu as pltpu

EPS = 1e-5

# Row indices inside the packed (N_ROWS, W) parameter blob.
R_BN0_G, R_BN0_B = 0, 1
R_B1, R_BN1_G, R_BN1_B, R_A1 = 2, 3, 4, 5
R_B2, R_BN2_G, R_BN2_B, R_A2 = 6, 7, 8, 9
R_B3, R_BN3_G, R_BN3_B, R_A3 = 10, 11, 12, 13
R_WC0, R_WC1, R_BC = 14, 15, 16
N_ROWS = 17


def adversary_kernel(x_ref, w1_ref, w2_ref, w3_ref, p_ref, out_ref):
    B, feat = x_ref.shape
    h1 = w1_ref.shape[1]                      # 10
    h2 = w2_ref.shape[1]                      # 10
    h3 = w3_ref.shape[1]                      # 2
    C = (out_ref.shape[1] - h3) // 2          # num_classes
    inv_n = 1.0 / B

    def prow(r, n):
        # (1, n) static slice of the packed parameter blob.
        return p_ref[r:r + 1, 0:n]

    def bn_train(h, g_row, b_row, n):
        # PyTorch BatchNorm1d training mode: batch mean, biased batch variance.
        # sum(h) and sum(h*h) are independent reductions -> shorter XLU chain
        # than mean((h-mean)^2).  (Slight cancellation risk is acceptable for
        # normalized activations.)
        s1 = jnp.sum(h, axis=0, keepdims=True)
        s2 = jnp.sum(h * h, axis=0, keepdims=True)
        mean = s1 * inv_n
        var = s2 * inv_n - mean * mean
        return (h - mean) * jax.lax.rsqrt(var + EPS) * prow(g_row, n) + prow(b_row, n)

    def prelu(h, a_row, n):
        a = prow(a_row, n)
        return jnp.where(h >= 0, h, a * h)

    x = x_ref[...].astype(jnp.float32)

    h = bn_train(x, R_BN0_G, R_BN0_B, feat)                                     # BatchNorm1d(64)
    h = jnp.dot(h, w1_ref[...], preferred_element_type=jnp.float32) + prow(R_B1, h1)  # Linear(64,10)
    h = bn_train(h, R_BN1_G, R_BN1_B, h1)                                       # BatchNorm1d(10)
    h = prelu(h, R_A1, h1)                                                      # PReLU(10)
    h = jnp.dot(h, w2_ref[...], preferred_element_type=jnp.float32) + prow(R_B2, h2)  # Linear(10,10)
    h = bn_train(h, R_BN2_G, R_BN2_B, h2)                                       # BatchNorm1d(10)
    h = prelu(h, R_A2, 1)                                                       # PReLU() shared alpha
    h = jnp.dot(h, w3_ref[...], preferred_element_type=jnp.float32) + prow(R_B3, h3)  # Linear(10,2)
    h = bn_train(h, R_BN3_G, R_BN3_B, h3)                                       # BatchNorm1d(2)
    z = prelu(h, R_A3, 1)                                                       # PReLU() shared alpha

    # classlayer: Linear(2, C).  K=2 -> two broadcast FMAs on the VPU instead
    # of an MXU round-trip.
    out1 = (z[:, 0:1] * prow(R_WC0, C)
            + z[:, 1:2] * prow(R_WC1, C)
            + prow(R_BC, C))

    # Numerically stable log-softmax / softmax along dim=1.
    m = jnp.max(out1, axis=1, keepdims=True)
    shifted = out1 - m
    lse = jnp.log(jnp.sum(jnp.exp(shifted), axis=1, keepdims=True))
    logsm = shifted - lse
    prob = jnp.exp(logsm)          # exact exp(log_softmax); no reciprocal needed

    # Single packed output slab: [log_softmax | z | softmax]
    out_ref[...] = jnp.concatenate([logsm, z, prob], axis=1)


def init_params(key, embed_length=64, num_classes=2):
    """Deterministic parameter init (PyTorch-like uniform for Linear layers)."""
    keys = jax.random.split(key, 8)

    def lin(kw, kb, fan_in, fan_out):
        bound = 1.0 / (fan_in ** 0.5)
        w = jax.random.uniform(kw, (fan_in, fan_out), jnp.float32, -bound, bound)
        b = jax.random.uniform(kb, (1, fan_out), jnp.float32, -bound, bound)
        return w, b

    w1, b1 = lin(keys[0], keys[1], embed_length, 10)
    w2, b2 = lin(keys[2], keys[3], 10, 10)
    w3, b3 = lin(keys[4], keys[5], 10, 2)
    wc, bc = lin(keys[6], keys[7], 2, num_classes)

    ones = lambda n: jnp.ones((1, n), jnp.float32)
    zeros = lambda n: jnp.zeros((1, n), jnp.float32)

    return {
        "bn0_g": ones(embed_length), "bn0_b": zeros(embed_length),
        "w1": w1, "b1": b1, "bn1_g": ones(10), "bn1_b": zeros(10),
        "a1": jnp.full((1, 10), 0.25, jnp.float32),        # PReLU(10)
        "w2": w2, "b2": b2, "bn2_g": ones(10), "bn2_b": zeros(10),
        "a2": jnp.full((1, 1), 0.25, jnp.float32),         # PReLU()
        "w3": w3, "b3": b3, "bn3_g": ones(2), "bn3_b": zeros(2),
        "a3": jnp.full((1, 1), 0.25, jnp.float32),         # PReLU()
        "wc": wc, "bc": bc,
    }


def pack_params(params, embed_length=64, num_classes=2):
    """Pack all 1-D parameters into one (N_ROWS, W) blob (done once, not per call)."""
    W = max(embed_length, num_classes, 10)

    def row(v):
        v = jnp.asarray(v, jnp.float32).reshape(-1)
        return jnp.pad(v, (0, W - v.shape[0]))

    rows = [
        row(params["bn0_g"]), row(params["bn0_b"]),
        row(params["b1"]), row(params["bn1_g"]), row(params["bn1_b"]), row(params["a1"]),
        row(params["b2"]), row(params["bn2_g"]), row(params["bn2_b"]), row(params["a2"]),
        row(params["b3"]), row(params["bn3_g"]), row(params["bn3_b"]), row(params["a3"]),
        row(params["wc"][0]), row(params["wc"][1]),
        row(params["bc"]),
    ]
    pblob = jnp.stack(rows, axis=0)   # (17, W)
    return params["w1"], params["w2"], params["w3"], pblob


def german_adversary_forward(x, packed):
    w1, w2, w3, pblob = packed
    B = x.shape[0]
    num_classes = pblob.shape[0] and (w3.shape[1] + 0)  # placeholder, replaced below
    num_classes = pblob[R_BC:R_BC + 1].shape[1]         # not informative; use wc width
    # num_classes is encoded in the packed wc/bc rows only up to padding;
    # recover it from the unpadded classlayer width passed via w3/out slab:
    # here it equals the original wc.shape[1]; store it on the blob width side.
    # Simpler: infer from static attribute attached at pack time.
    num_classes = packed_num_classes_from(pblob)

    C = num_classes
    W_out = 2 * C + w3.shape[1]   # log_softmax | z | softmax

    vmem = lambda: pl.BlockSpec(memory_space=pltpu.MemorySpace.VMEM)
    slab = pl.pallas_call(
        adversary_kernel,
        out_shape=jax.ShapeDtypeStruct((B, W_out), jnp.float32),
        in_specs=[vmem() for _ in range(5)],
        out_specs=vmem(),
        # NOTE(v7x): whole batch stays VMEM-resident; at very large B re-derive
        # the VMEM budget (64 MiB/TC) and switch to a batch-tiled two-pass BN.
    )(x, w1, w2, w3, pblob)

    out = slab[:, 0:C]
    z = slab[:, C:C + 2]
    prob = slab[:, C + 2:C + 2 + C]
    return out, z, prob


# --- small helper: num_classes is a static Python int decided at pack time ---
_NUM_CLASSES_STATIC = {"n": 2}


def packed_num_classes_from(_pblob):
    return _NUM_CLASSES_STATIC["n"]


if __name__ == "__main__":
    key = jax.random.PRNGKey(0)
    k_x, k_p = jax.random.split(key)

    B, EMBED, NUM_CLASSES = 8, 64, 2
    _NUM_CLASSES_STATIC["n"] = NUM_CLASSES

    x = jax.random.normal(k_x, (B, EMBED), jnp.float32)
    params = init_params(k_p, embed_length=EMBED, num_classes=NUM_CLASSES)
    packed = pack_params(params, embed_length=EMBED, num_classes=NUM_CLASSES)

    fwd = jax.jit(german_adversary_forward)
    out, z, prob = fwd(x, packed)
    jax.block_until_ready((out, z, prob))

    assert out.shape == (B, NUM_CLASSES)
    assert z.shape == (B, 2)
    assert prob.shape == (B, NUM_CLASSES)
    # sanity: softmax rows sum to 1, exp(log_softmax) == softmax
    assert bool(jnp.allclose(jnp.sum(prob, axis=1), 1.0, atol=1e-5))
    assert bool(jnp.allclose(jnp.exp(out), prob, atol=1e-5))

    print("KERNEL_OK")
</pallas_src>

<mosaic_0001>
module attributes {stable_mosaic.version = 11 : i64} {
  func.func @adversary_kernel(%arg0: memref<8x64xf32, #tpu.memory_space<vmem>>, %arg1: memref<64x10xf32, #tpu.memory_space<vmem>>, %arg2: memref<10x10xf32, #tpu.memory_space<vmem>>, %arg3: memref<10x2xf32, #tpu.memory_space<vmem>>, %arg4: memref<17x64xf32, #tpu.memory_space<vmem>>, %arg5: memref<8x6xf32, #tpu.memory_space<vmem>>) attributes {dimension_semantics = [], scalar_prefetch = 0 : i64, scratch_operands = 0 : i64, tpu.core_type = #tpu.core_type<tc>} {
    %c0 = arith.constant 0 : index
    %c0_0 = arith.constant 0 : index
    %0 = vector.load %arg0[%c0, %c0_0] : memref<8x64xf32, #tpu.memory_space<vmem>>, vector<8x64xf32>
    %cst = arith.constant dense<0.000000e+00> : vector<64xf32>
    %1 = vector.multi_reduction <add>, %0, %cst [0] : vector<8x64xf32> to vector<64xf32>
    %2 = vector.shape_cast %1 : vector<64xf32> to vector<1x64xf32>
    %3 = arith.mulf %0, %0 : vector<8x64xf32>
    %cst_1 = arith.constant dense<0.000000e+00> : vector<64xf32>
    %4 = vector.multi_reduction <add>, %3, %cst_1 [0] : vector<8x64xf32> to vector<64xf32>
    %5 = vector.shape_cast %4 : vector<64xf32> to vector<1x64xf32>
    %cst_2 = arith.constant 1.250000e-01 : f32
    %6 = vector.broadcast %cst_2 : f32 to vector<1x64xf32>
    %7 = arith.mulf %2, %6 : vector<1x64xf32>
    %cst_3 = arith.constant 1.250000e-01 : f32
    %8 = vector.broadcast %cst_3 : f32 to vector<1x64xf32>
    %9 = arith.mulf %5, %8 : vector<1x64xf32>
    %10 = arith.mulf %7, %7 : vector<1x64xf32>
    %11 = arith.subf %9, %10 : vector<1x64xf32>
    %12 = vector.broadcast %7 : vector<1x64xf32> to vector<8x64xf32>
    %13 = arith.subf %0, %12 : vector<8x64xf32>
    %cst_4 = arith.constant 9.99999974E-6 : f32
    %14 = vector.broadcast %cst_4 : f32 to vector<1x64xf32>
    %15 = arith.addf %11, %14 : vector<1x64xf32>
    %16 = math.rsqrt %15 : vector<1x64xf32>
    %17 = vector.broadcast %16 : vector<1x64xf32> to vector<8x64xf32>
    %18 = arith.mulf %13, %17 : vector<8x64xf32>
    %c0_5 = arith.constant 0 : index
    %c0_6 = arith.constant 0 : index
    %19 = vector.load %arg4[%c0_5, %c0_6] : memref<17x64xf32, #tpu.memory_space<vmem>>, vector<1x64xf32>
    %20 = vector.broadcast %19 : vector<1x64xf32> to vector<8x64xf32>
    %21 = arith.mulf %18, %20 : vector<8x64xf32>
    %c1 = arith.constant 1 : index
    %c0_7 = arith.constant 0 : index
    %22 = vector.load %arg4[%c1, %c0_7] : memref<17x64xf32, #tpu.memory_space<vmem>>, vector<1x64xf32>
    %23 = vector.broadcast %22 : vector<1x64xf32> to vector<8x64xf32>
    %24 = arith.addf %21, %23 : vector<8x64xf32>
    %c0_8 = arith.constant 0 : index
    %c0_9 = arith.constant 0 : index
    %25 = vector.load %arg1[%c0_8, %c0_9] : memref<64x10xf32, #tpu.memory_space<vmem>>, vector<64x10xf32>
    %cst_10 = arith.constant dense<0.000000e+00> : vector<8x10xf32>
    %26 = tpu.matmul %24, %25, %cst_10 {dimension_numbers = #tpu.dot_dimension_numbers<[1], [0], [0], [1], [0, 0, 1, 1], [], []>} : vector<8x64xf32>, vector<64x10xf32>, vector<8x10xf32> -> vector<8x10xf32>
    %c2 = arith.constant 2 : index
    %c0_11 = arith.constant 0 : index
    %27 = vector.load %arg4[%c2, %c0_11] : memref<17x64xf32, #tpu.memory_space<vmem>>, vector<1x10xf32>
    %28 = vector.broadcast %27 : vector<1x10xf32> to vector<8x10xf32>
    %29 = arith.addf %26, %28 : vector<8x10xf32>
    %cst_12 = arith.constant dense<0.000000e+00> : vector<10xf32>
    %30 = vector.multi_reduction <add>, %29, %cst_12 [0] : vector<8x10xf32> to vector<10xf32>
    %31 = vector.shape_cast %30 : vector<10xf32> to vector<1x10xf32>
    %32 = arith.mulf %29, %29 : vector<8x10xf32>
    %cst_13 = arith.constant dense<0.000000e+00> : vector<10xf32>
    %33 = vector.multi_reduction <add>, %32, %cst_13 [0] : vector<8x10xf32> to vector<10xf32>
    %34 = vector.shape_cast %33 : vector<10xf32> to vector<1x10xf32>
    %cst_14 = arith.constant 1.250000e-01 : f32
    %35 = vector.broadcast %cst_14 : f32 to vector<1x10xf32>
    %36 = arith.mulf %31, %35 : vector<1x10xf32>
    %cst_15 = arith.constant 1.250000e-01 : f32
    %37 = vector.broadcast %cst_15 : f32 to vector<1x10xf32>
    %38 = arith.mulf %34, %37 : vector<1x10xf32>
    %39 = arith.mulf %36, %36 : vector<1x10xf32>
    %40 = arith.subf %38, %39 : vector<1x10xf32>
    %41 = vector.broadcast %36 : vector<1x10xf32> to vector<8x10xf32>
    %42 = arith.subf %29, %41 : vector<8x10xf32>
    %cst_16 = arith.constant 9.99999974E-6 : f32
    %43 = vector.broadcast %cst_16 : f32 to vector<1x10xf32>
    %44 = arith.addf %40, %43 : vector<1x10xf32>
    %45 = math.rsqrt %44 : vector<1x10xf32>
    %46 = vector.broadcast %45 : vector<1x10xf32> to vector<8x10xf32>
    %47 = arith.mulf %42, %46 : vector<8x10xf32>
    %c3 = arith.constant 3 : index
    %c0_17 = arith.constant 0 : index
    %48 = vector.load %arg4[%c3, %c0_17] : memref<17x64xf32, #tpu.memory_space<vmem>>, vector<1x10xf32>
    %49 = vector.broadcast %48 : vector<1x10xf32> to vector<8x10xf32>
    %50 = arith.mulf %47, %49 : vector<8x10xf32>
    %c4 = arith.constant 4 : index
    %c0_18 = arith.constant 0 : index
    %51 = vector.load %arg4[%c4, %c0_18] : memref<17x64xf32, #tpu.memory_space<vmem>>, vector<1x10xf32>
    %52 = vector.broadcast %51 : vector<1x10xf32> to vector<8x10xf32>
    %53 = arith.addf %50, %52 : vector<8x10xf32>
    %c5 = arith.constant 5 : index
    %c0_19 = arith.constant 0 : index
    %54 = vector.load %arg4[%c5, %c0_19] : memref<17x64xf32, #tpu.memory_space<vmem>>, vector<1x10xf32>
    %cst_20 = arith.constant 0.000000e+00 : f32
    %55 = vector.broadcast %cst_20 : f32 to vector<8x10xf32>
    %56 = arith.cmpf oge, %53, %55 : vector<8x10xf32>
    %57 = vector.broadcast %54 : vector<1x10xf32> to vector<8x10xf32>
    %58 = arith.mulf %57, %53 : vector<8x10xf32>
    %59 = arith.select %56, %53, %58 : vector<8x10xi1>, vector<8x10xf32>
    %c0_21 = arith.constant 0 : index
    %c0_22 = arith.constant 0 : index
    %60 = vector.load %arg2[%c0_21, %c0_22] : memref<10x10xf32, #tpu.memory_space<vmem>>, vector<10x10xf32>
    %cst_23 = arith.constant dense<0.000000e+00> : vector<8x10xf32>
    %61 = tpu.matmul %59, %60, %cst_23 {dimension_numbers = #tpu.dot_dimension_numbers<[1], [0], [0], [1], [0, 0, 1, 1], [], []>} : vector<8x10xf32>, vector<10x10xf32>, vector<8x10xf32> -> vector<8x10xf32>
    %c6 = arith.constant 6 : index
    %c0_24 = arith.constant 0 : index
    %62 = vector.load %arg4[%c6, %c0_24] : memref<17x64xf32, #tpu.memory_space<vmem>>, vector<1x10xf32>
    %63 = vector.broadcast %62 : vector<1x10xf32> to vector<8x10xf32>
    %64 = arith.addf %61, %63 : vector<8x10xf32>
    %cst_25 = arith.constant dense<0.000000e+00> : vector<10xf32>
    %65 = vector.multi_reduction <add>, %64, %cst_25 [0] : vector<8x10xf32> to vector<10xf32>
    %66 = vector.shape_cast %65 : vector<10xf32> to vector<1x10xf32>
    %67 = arith.mulf %64, %64 : vector<8x10xf32>
    %cst_26 = arith.constant dense<0.000000e+00> : vector<10xf32>
    %68 = vector.multi_reduction <add>, %67, %cst_26 [0] : vector<8x10xf32> to vector<10xf32>
    %69 = vector.shape_cast %68 : vector<10xf32> to vector<1x10xf32>
    %cst_27 = arith.constant 1.250000e-01 : f32
    %70 = vector.broadcast %cst_27 : f32 to vector<1x10xf32>
    %71 = arith.mulf %66, %70 : vector<1x10xf32>
    %cst_28 = arith.constant 1.250000e-01 : f32
    %72 = vector.broadcast %cst_28 : f32 to vector<1x10xf32>
    %73 = arith.mulf %69, %72 : vector<1x10xf32>
    %74 = arith.mulf %71, %71 : vector<1x10xf32>
    %75 = arith.subf %73, %74 : vector<1x10xf32>
    %76 = vector.broadcast %71 : vector<1x10xf32> to vector<8x10xf32>
    %77 = arith.subf %64, %76 : vector<8x10xf32>
    %cst_29 = arith.constant 9.99999974E-6 : f32
    %78 = vector.broadcast %cst_29 : f32 to vector<1x10xf32>
    %79 = arith.addf %75, %78 : vector<1x10xf32>
    %80 = math.rsqrt %79 : vector<1x10xf32>
    %81 = vector.broadcast %80 : vector<1x10xf32> to vector<8x10xf32>
    %82 = arith.mulf %77, %81 : vector<8x10xf32>
    %c7 = arith.constant 7 : index
    %c0_30 = arith.constant 0 : index
    %83 = vector.load %arg4[%c7, %c0_30] : memref<17x64xf32, #tpu.memory_space<vmem>>, vector<1x10xf32>
    %84 = vector.broadcast %83 : vector<1x10xf32> to vector<8x10xf32>
    %85 = arith.mulf %82, %84 : vector<8x10xf32>
    %c8 = arith.constant 8 : index
    %c0_31 = arith.constant 0 : index
    %86 = vector.load %arg4[%c8, %c0_31] : memref<17x64xf32, #tpu.memory_space<vmem>>, vector<1x10xf32>
    %87 = vector.broadcast %86 : vector<1x10xf32> to vector<8x10xf32>
    %88 = arith.addf %85, %87 : vector<8x10xf32>
    %c9 = arith.constant 9 : index
    %c0_32 = arith.constant 0 : index
    %89 = vector.load %arg4[%c9, %c0_32] : memref<17x64xf32, #tpu.memory_space<vmem>>, vector<1x1xf32>
    %cst_33 = arith.constant 0.000000e+00 : f32
    %90 = vector.broadcast %cst_33 : f32 to vector<8x10xf32>
    %91 = arith.cmpf oge, %88, %90 : vector<8x10xf32>
    %92 = vector.broadcast %89 : vector<1x1xf32> to vector<8x10xf32>
    %93 = arith.mulf %92, %88 : vector<8x10xf32>
    %94 = arith.select %91, %88, %93 : vector<8x10xi1>, vector<8x10xf32>
    %c0_34 = arith.constant 0 : index
    %c0_35 = arith.constant 0 : index
    %95 = vector.load %arg3[%c0_34, %c0_35] : memref<10x2xf32, #tpu.memory_space<vmem>>, vector<10x2xf32>
    %cst_36 = arith.constant dense<0.000000e+00> : vector<8x2xf32>
    %96 = tpu.matmul %94, %95, %cst_36 {dimension_numbers = #tpu.dot_dimension_numbers<[1], [0], [0], [1], [0, 0, 1, 1], [], []>} : vector<8x10xf32>, vector<10x2xf32>, vector<8x2xf32> -> vector<8x2xf32>
    %c10 = arith.constant 10 : index
    %c0_37 = arith.constant 0 : index
    %97 = vector.load %arg4[%c10, %c0_37] : memref<17x64xf32, #tpu.memory_space<vmem>>, vector<1x2xf32>
    %98 = vector.broadcast %97 : vector<1x2xf32> to vector<8x2xf32>
    %99 = arith.addf %96, %98 : vector<8x2xf32>
    %cst_38 = arith.constant dense<0.000000e+00> : vector<2xf32>
    %100 = vector.multi_reduction <add>, %99, %cst_38 [0] : vector<8x2xf32> to vector<2xf32>
    %101 = vector.shape_cast %100 : vector<2xf32> to vector<1x2xf32>
    %102 = arith.mulf %99, %99 : vector<8x2xf32>
    %cst_39 = arith.constant dense<0.000000e+00> : vector<2xf32>
    %103 = vector.multi_reduction <add>, %102, %cst_39 [0] : vector<8x2xf32> to vector<2xf32>
    %104 = vector.shape_cast %103 : vector<2xf32> to vector<1x2xf32>
    %cst_40 = arith.constant 1.250000e-01 : f32
    %105 = vector.broadcast %cst_40 : f32 to vector<1x2xf32>
    %106 = arith.mulf %101, %105 : vector<1x2xf32>
    %cst_41 = arith.constant 1.250000e-01 : f32
    %107 = vector.broadcast %cst_41 : f32 to vector<1x2xf32>
    %108 = arith.mulf %104, %107 : vector<1x2xf32>
    %109 = arith.mulf %106, %106 : vector<1x2xf32>
    %110 = arith.subf %108, %109 : vector<1x2xf32>
    %111 = vector.broadcast %106 : vector<1x2xf32> to vector<8x2xf32>
    %112 = arith.subf %99, %111 : vector<8x2xf32>
    %cst_42 = arith.constant 9.99999974E-6 : f32
    %113 = vector.broadcast %cst_42 : f32 to vector<1x2xf32>
    %114 = arith.addf %110, %113 : vector<1x2xf32>
    %115 = math.rsqrt %114 : vector<1x2xf32>
    %116 = vector.broadcast %115 : vector<1x2xf32> to vector<8x2xf32>
    %117 = arith.mulf %112, %116 : vector<8x2xf32>
    %c11 = arith.constant 11 : index
    %c0_43 = arith.constant 0 : index
    %118 = vector.load %arg4[%c11, %c0_43] : memref<17x64xf32, #tpu.memory_space<vmem>>, vector<1x2xf32>
    %119 = vector.broadcast %118 : vector<1x2xf32> to vector<8x2xf32>
    %120 = arith.mulf %117, %119 : vector<8x2xf32>
    %c12 = arith.constant 12 : index
    %c0_44 = arith.constant 0 : index
    %121 = vector.load %arg4[%c12, %c0_44] : memref<17x64xf32, #tpu.memory_space<vmem>>, vector<1x2xf32>
    %122 = vector.broadcast %121 : vector<1x2xf32> to vector<8x2xf32>
    %123 = arith.addf %120, %122 : vector<8x2xf32>
    %c13 = arith.constant 13 : index
    %c0_45 = arith.constant 0 : index
    %124 = vector.load %arg4[%c13, %c0_45] : memref<17x64xf32, #tpu.memory_space<vmem>>, vector<1x1xf32>
    %cst_46 = arith.constant 0.000000e+00 : f32
    %125 = vector.broadcast %cst_46 : f32 to vector<8x2xf32>
    %126 = arith.cmpf oge, %123, %125 : vector<8x2xf32>
    %127 = vector.broadcast %124 : vector<1x1xf32> to vector<8x2xf32>
    %128 = arith.mulf %127, %123 : vector<8x2xf32>
    %129 = arith.select %126, %123, %128 : vector<8x2xi1>, vector<8x2xf32>
    %130 = vector.extract_strided_slice %129 {offsets = [0, 0], sizes = [8, 1], strides = [1, 1]} : vector<8x2xf32> to vector<8x1xf32>
    %c14 = arith.constant 14 : index
    %c0_47 = arith.constant 0 : index
    %131 = vector.load %arg4[%c14, %c0_47] : memref<17x64xf32, #tpu.memory_space<vmem>>, vector<1x2xf32>
    %132 = vector.broadcast %130 : vector<8x1xf32> to vector<8x2xf32>
    %133 = vector.broadcast %131 : vector<1x2xf32> to vector<8x2xf32>
    %134 = arith.mulf %132, %133 : vector<8x2xf32>
    %135 = vector.extract_strided_slice %129 {offsets = [0, 1], sizes = [8, 1], strides = [1, 1]} : vector<8x2xf32> to vector<8x1xf32>
    %c15 = arith.constant 15 : index
    %c0_48 = arith.constant 0 : index
    %136 = vector.load %arg4[%c15, %c0_48] : memref<17x64xf32, #tpu.memory_space<vmem>>, vector<1x2xf32>
    %137 = vector.broadcast %135 : vector<8x1xf32> to vector<8x2xf32>
    %138 = vector.broadcast %136 : vector<1x2xf32> to vector<8x2xf32>
    %139 = arith.mulf %137, %138 : vector<8x2xf32>
    %140 = arith.addf %134, %139 : vector<8x2xf32>
    %c16 = arith.constant 16 : index
    %c0_49 = arith.constant 0 : index
    %141 = vector.load %arg4[%c16, %c0_49] : memref<17x64xf32, #tpu.memory_space<vmem>>, vector<1x2xf32>
    %142 = vector.broadcast %141 : vector<1x2xf32> to vector<8x2xf32>
    %143 = arith.addf %140, %142 : vector<8x2xf32>
    %cst_50 = arith.constant dense<0xFF800000> : vector<8xf32>
    %144 = vector.multi_reduction <maximumf>, %143, %cst_50 [1] : vector<8x2xf32> to vector<8xf32>
    %145 = vector.shape_cast %144 : vector<8xf32> to vector<8x1xf32>
    %146 = vector.broadcast %145 : vector<8x1xf32> to vector<8x2xf32>
    %147 = arith.subf %143, %146 : vector<8x2xf32>
    %148 = math.exp %147 : vector<8x2xf32>
    %cst_51 = arith.constant dense<0.000000e+00> : vector<8xf32>
    %149 = vector.multi_reduction <add>, %148, %cst_51 [1] : vector<8x2xf32> to vector<8xf32>
    %150 = vector.shape_cast %149 : vector<8xf32> to vector<8x1xf32>
    %151 = math.log %150 : vector<8x1xf32>
    %152 = vector.broadcast %151 : vector<8x1xf32> to vector<8x2xf32>
    %153 = arith.subf %147, %152 : vector<8x2xf32>
    %154 = math.exp %153 : vector<8x2xf32>
    %155 = tpu.concatenate %153, %129, %154 in 1 : vector<8x2xf32>, vector<8x2xf32>, vector<8x2xf32> -> vector<8x6xf32>
    %c0_52 = arith.constant 0 : index
    %c0_53 = arith.constant 0 : index
    %156 = vector.load %arg5[%c0_52, %c0_53] : memref<8x6xf32, #tpu.memory_space<vmem>>, vector<8x6xf32>
    tpu.vector_store %arg5[%c0_52, %c0_53], %155 {strides = array<i32>} : memref<8x6xf32, #tpu.memory_space<vmem>>, vector<8x6xf32>,
    return
  }
}

</mosaic_0001>

<bundles_post_ra>
// kernel: german_adversary_forward.1
= control target key start
LH: loop header
LB: loop body
LE: loop exit
PB: predicated region body
PF: predicated region fallthrough
CT: control target
= control target key end

     0   :  { %v615_v0 = vmov 0.0|0.0   ;;  %vm616_vm0 = vmmov 0   ;;  %v617_v4 = vmov 0.0   ;;  %vm21_vm1 = vcmask 523264   ;;  %s621_s23 = smov 2   ;;  %s780_s1 = inlined_call_operand.vmem [shape: f32[64,10], index: 1, kind: input, shape index: {}]   ;;  %s781_s0 = inlined_call_operand.vmem [shape: f32[8,64], index: 0, kind: input, shape index: {}]   ;;  %s782_s4 = inlined_call_operand.vmem [shape: f32[17,64], index: 4, kind: input, shape index: {}]   ;;  %s783_s2 = inlined_call_operand.vmem [shape: f32[10,10], index: 2, kind: input, shape index: {}]   ;;  %s784_s3 = inlined_call_operand.vmem [shape: f32[10,2], index: 3, kind: input, shape index: {}]   ;;  %s785_s5 = inlined_call_operand.vmem [shape: f32[8,6], index: 5, kind: output, shape index: {}]  }
   0x1   :  { %567 = vmatprep.subr.bf16.mxu0 %v615_v0  ;;  %v57_v1 = vld [vmem:[%s780_s1] sm:$0xff]  ;;  %v58_v2 = vld [vmem:[%s780_s1 + $0x8] sm:$0xff]  ;;  %v59_v3 = vld [vmem:[%s780_s1 + $0x10] sm:$0xff]  ;;  %550 = vmatprep.mubr.msk.f32.mxu0 %vm616_vm0, %v617_v4  ;;  %vm197_vm2 = vcmask 1041408   ;;  %vm618_vm3 = vmmov 1   ;;  %vm143_vm5 = vcmask 80896  }
   0x2   :  { %v568_v5 = vpack.c.bf16 %v58_v2, %v57_v1  ;;  %v60_v6 = vld [vmem:[%s780_s1 + $0x18] sm:$0xff]  ;;  %579 = vmatprep.subr.bf16.mxu1 %v615_v0  ;;  %557 = vmatprep.mubr.msk.f32.mxu1 %vm616_vm0, %v617_v4  ;;  %v20_v7 = vld [vmem:[%s781_s0] sm:$0xff]  ;;  %v62_v12 = vld [vmem:[%s780_s1 + $0x28] sm:$0xff]  ;;  %vm397_vm8 = vcmask 15360   ;;  %vm491_vm10 = vcmask 31744   ;;  %vm493_vm11 = vcmask 48128  }
   0x3   :  { %v571_v8 = vpack.c.bf16 %v60_v6, %v59_v3  ;;  %v22_v9 = vsel %vm21_vm1, %v20_v7, 0.0  ;;  %v29_v10 = vmul.f32 %v20_v7, %v20_v7  ;;  %v61_v11 = vld [vmem:[%s780_s1 + $0x20] sm:$0xff]  ;;  %v63_v18 = vld [vmem:[%s780_s1 + $0x30] sm:$0xff]  ;;  %v64_v19 = vld [vmem:[%s780_s1 + $0x38] sm:$0xff] }
   0x4   :  { %569 = vmatpush3.bf16.msra.mxu0 %v568_v5  ;;  %v23_v13 = vrot.slane %v22_v9, 4  ;;  %v574_v17 = vpack.c.bf16 %v62_v12, %v61_v11  ;;  %v577_v24 = vpack.c.bf16 %v64_v19, %v63_v18  ;;  %v499_v37 = vld [vmem:[%s782_s4] ss:$0 sm:$0xff]  ;;  %v500_v39 = vld [vmem:[%s782_s4 + $0x1] ss:$0 sm:$0xff]  ;;  %vm704_vm4 = vmpackc.low %vm197_vm2, %vm618_vm3 }
   0x5   :  { %570 = vmatprep.subr.bf16.mxu0 %v615_v0  ;;  %v30_v14 = vsel %vm21_vm1, %v29_v10, 0.0  ;;  %v187_v42 = vld [vmem:[%s783_s2] sm:$0xff]  ;;  %v188_v43 = vld [vmem:[%s783_s2 + $0x8] sm:$0x3] }
   0x6   :  { %v24_v15 = vadd.f32 %v23_v13, %v22_v9  ;;  %v31_v16 = vrot.slane %v30_v14, 4  ;;  %v580_v45 = vpack.c.bf16 %v188_v43, %v187_v42  ;;  %v306_v46 = vld [vmem:[%s782_s4 + $0x9] sm:$0x1]  ;;  %v501_v47 = vld [vmem:[%s782_s4 + $0x2] ss:$0 sm:$0xff] }
   0x7   :  { %587 = vpush %v306_v46  ;;  %v503_v10 = vld [vmem:[%s782_s4 + $0x3] ss:$0 sm:$0xff]  ;;  %v504_v12 = vld [vmem:[%s782_s4 + $0x4] ss:$0 sm:$0xff]  ;;  %v315_v19 = vld [vmem:[%s784_s3 + $0x8] sm:$0x3] }
   0x8   :  { %572 = vmatpush3.bf16.msra.mxu0 %v571_v8  ;;  %v25_v20 = vrot.slane %v24_v15, 2  ;;  %v32_v21 = vadd.f32 %v31_v16, %v30_v14  ;;  %582 = vmatpush3.bf16.msk.msra.mxu1 %vm704_vm4, %v580_v45  ;;  %v505_v14 = vld [vmem:[%s782_s4 + $0x5] ss:$0 sm:$0xff] }
   0x9   :  { %573 = vmatprep.subr.bf16.mxu0 %v615_v0  ;;  %583 = vmatprep.subr.bf16.mxu1 %v615_v0  ;;  %v314_v18 = vld [vmem:[%s784_s3] sm:$0xff] }
   0xa   :  { %v26_v22 = vadd.f32 %v25_v20, %v24_v15  ;;  %v33_v23 = vrot.slane %v32_v21, 2  ;;  %v584_v20 = vpack.c.bf16 %v315_v19, %v314_v18  ;;  %v514_v19 = vld [vmem:[%s782_s4 + $0xb] ss:$0 sm:$0xff] }
   0xc   :  { %575 = vmatpush3.bf16.msra.mxu0 %v574_v17  ;;  %v27_v25 = vrot.slane %v26_v22, 1  ;;  %v34_v26 = vadd.f32 %v33_v23, %v32_v21  ;;  %v433_v21 = vld [vmem:[%s782_s4 + $0xd] sm:$0x1] }
   0xd   :  { %576 = vmatprep.subr.bf16.mxu0 %v615_v0  ;;  %589 = vpush %v433_v21  ;;  %v515_v21 = vld [vmem:[%s782_s4 + $0xc] ss:$0 sm:$0xff] }
   0xe   :  { %v28_v27 = vadd.f32 %v27_v25, %v26_v22  ;;  %v35_v28 = vrot.slane %v34_v26, 1 }
  0x10   :  { %578 = vmatpush3.bf16.msra.mxu0 %v577_v24  ;;  %v36_v29 = vadd.f32 %v35_v28, %v34_v26  ;;  %v37_v30 = vmul.f32 0.125, %v28_v27 }
  0x12   :  { %v38_v31 = vmul.f32 0.125, %v36_v29  ;;  %v39_v32 = vmul.f32 %v37_v30, %v37_v30  ;;  %v41_v35 = vsub.f32 %v20_v7, %v37_v30 }
  0x14   :  { %v40_v33 = vsub.f32 %v38_v31, %v39_v32 }
  0x16   :  { %v42_v34 = vadd.f32 1e-05, %v40_v33 }
  0x18   :  { %601 = vrsqrt.f32 %v42_v34 }
  0x22   :  { %v602_v36 = vpop.eup %601 }
  0x23   :  { %v44_v38 = vmul.f32 %v602_v36, %v41_v35 }
  0x25   :  { %v50_v40 = vmul.f32 %v499_v37, %v44_v38 }
  0x27   :  { %v56_v41 = vadd.f32 %v500_v39, %v50_v40 }
  0x29   :  { %551 = vmatmul.mubr.msk.f32.vlgmr.msra.gmra.mrb[0].mxu0 %vm21_vm1, %v56_v41 }
  0x38   :  { %s588_s9 = spop %587 }
  0x3e   :  { %s590_s15 = spop %589 }
  0xfc   :  { %v139_v48 = vpop.f32.mrb[0].mxu0 }
  0xfd   :  { %v140_v49 = vadd.f32 %v501_v47, %v139_v48  ;;  %v552_v50 = vpop.f32.mrb[1].mxu0  ;;  %v509_v47 = vld [vmem:[%s782_s4 + $0x7] ss:$0 sm:$0xff] }
  0xff   :  { %v144_v51 = vsel %vm143_vm5, %v140_v49, 0.0  ;;  %v151_v52 = vmul.f32 %v140_v49, %v140_v49 }
 0x100   :  { %v145_v53 = vrot.slane %v144_v51, 4 }
 0x101   :  { %v152_v54 = vsel %vm143_vm5, %v151_v52, 0.0 }
 0x102   :  { %v146_v55 = vadd.f32 %v145_v53, %v144_v51  ;;  %v153_v56 = vrot.slane %v152_v54, 4  ;;  %v310_v51 = vstv %s588_s9 }
 0x104   :  { %v147_v57 = vrot.slane %v146_v55, 2  ;;  %v154_v58 = vadd.f32 %v153_v56, %v152_v54  ;;  %v511_v56 = vld [vmem:[%s782_s4 + $0xa] ss:$0 sm:$0xff] }
 0x106   :  { %v148_v59 = vadd.f32 %v147_v57, %v146_v55  ;;  %v155_v60 = vrot.slane %v154_v58, 2  ;;  %v619_v55 = vmov 0  }
 0x107   :  { %599 = vset.pattern.permute.xlu0 %v619_v55 }
 0x108   :  { %v149_v61 = vrot.slane %v148_v59, 1  ;;  %v156_v62 = vadd.f32 %v155_v60, %v154_v58 }
 0x10a   :  { %v150_v63 = vadd.f32 %v149_v61, %v148_v59  ;;  %v157_v0 = vrot.slane %v156_v62, 1 }
 0x10c   :  { %v158_v1 = vadd.f32 %v157_v0, %v156_v62  ;;  %v159_v2 = vmul.f32 0.125, %v150_v63 }
 0x10e   :  { %v160_v3 = vmul.f32 0.125, %v158_v1  ;;  %v161_v5 = vmul.f32 %v159_v2, %v159_v2  ;;  %v163_v8 = vsub.f32 %v140_v49, %v159_v2  ;;  %v510_v49 = vld [vmem:[%s782_s4 + $0x8] ss:$0 sm:$0xff] }
 0x110   :  { %v162_v6 = vsub.f32 %v160_v3, %v161_v5 }
 0x112   :  { %v164_v7 = vadd.f32 1e-05, %v162_v6 }
 0x114   :  { %603 = vrsqrt.f32 %v164_v7 }
 0x11e   :  { %v604_v9 = vpop.eup %603 }
 0x11f   :  { %v166_v11 = vmul.f32 %v604_v9, %v163_v8 }
 0x121   :  { %v172_v13 = vmul.f32 %v503_v10, %v166_v11 }
 0x123   :  { %v178_v15 = vadd.f32 %v504_v12, %v172_v13 }
 0x125   :  { %vm180_vm6 = vcmp.ge.f32.partialorder %v178_v15, 0.0  ;;  %v185_v16 = vmul.f32 %v505_v14, %v178_v15 }
 0x127   :  { %v186_v17 = vsel %vm180_vm6, %v178_v15, %v185_v16 }
 0x128   :  { %558 = vmatmul.mubr.msk.f32.vlgmr.msra.gmra.mrb[0].mxu1 %vm143_vm5, %v186_v17 }
 0x129   :  { %564 = vmatprep.mubr.msk.f32.mxu1 %vm616_vm0, %v617_v4  ;;  %586 = vmatpush3.bf16.msk.msra.mxu1 %vm704_vm4, %v584_v20  ;;  %v506_v4 = vld [vmem:[%s782_s4 + $0x6] ss:$0 sm:$0xff] }
 0x1fb   :  { %v267_v22 = vpop.f32.mrb[0].mxu1 }
 0x1fc   :  { %v268_v23 = vadd.f32 %v506_v4, %v267_v22  ;;  %v559_v24 = vpop.f32.mrb[1].mxu1  ;;  %v437_v22 = vstv %s590_s15 }
 0x1fe   :  { %v271_v25 = vsel %vm143_vm5, %v268_v23, 0.0  ;;  %v278_v26 = vmul.f32 %v268_v23, %v268_v23 }
 0x1ff   :  { %v272_v27 = vrot.slane %v271_v25, 4 }
 0x200   :  { %v279_v28 = vsel %vm143_vm5, %v278_v26, 0.0  ;;  %v620_v26 = vmov 1  }
 0x201   :  { %v273_v29 = vadd.f32 %v272_v27, %v271_v25  ;;  %v280_v30 = vrot.slane %v279_v28, 4 }
 0x203   :  { %v274_v31 = vrot.slane %v273_v29, 2  ;;  %v281_v32 = vadd.f32 %v280_v30, %v279_v28  ;;  %v516_v28 = vld [vmem:[%s782_s4 + $0xe] ss:$0 sm:$0xff] }
 0x205   :  { %v275_v33 = vadd.f32 %v274_v31, %v273_v29  ;;  %v282_v34 = vrot.slane %v281_v32, 2  ;;  %v517_v29 = vld [vmem:[%s782_s4 + $0xf] ss:$0 sm:$0xff] }
 0x207   :  { %v276_v35 = vrot.slane %v275_v33, 1  ;;  %v283_v36 = vadd.f32 %v282_v34, %v281_v32 }
 0x209   :  { %v277_v37 = vadd.f32 %v276_v35, %v275_v33  ;;  %v284_v38 = vrot.slane %v283_v36, 1  ;;  %v518_v33 = vld [vmem:[%s782_s4 + $0x10] ss:$0 sm:$0xff]  ;;  %s622_s4 = smov 4  }
 0x20b   :  { %v285_v39 = vadd.f32 %v284_v38, %v283_v36  ;;  %v286_v40 = vmul.f32 0.125, %v277_v37 }
 0x20d   :  { %v287_v41 = vmul.f32 0.125, %v285_v39  ;;  %v288_v42 = vmul.f32 %v286_v40, %v286_v40  ;;  %v290_v45 = vsub.f32 %v268_v23, %v286_v40 }
 0x20f   :  { %v289_v43 = vsub.f32 %v287_v41, %v288_v42 }
 0x211   :  { %v291_v44 = vadd.f32 1e-05, %v289_v43 }
 0x213   :  { %605 = vrsqrt.f32 %v291_v44 }
 0x21d   :  { %v606_v46 = vpop.eup %605 }
 0x21e   :  { %v293_v48 = vmul.f32 %v606_v46, %v290_v45 }
 0x220   :  { %v299_v50 = vmul.f32 %v509_v47, %v293_v48 }
 0x222   :  { %v305_v52 = vadd.f32 %v510_v49, %v299_v50 }
 0x224   :  { %v312_v53 = vmul.f32 %v310_v51, %v305_v52  ;;  %vm307_vm7 = vcmp.ge.f32.partialorder %v305_v52, 0.0 }
 0x226   :  { %v313_v54 = vsel %vm307_vm7, %v305_v52, %v312_v53 }
 0x227   :  { %565 = vmatmul.mubr.msk.f32.vlgmr.msra.gmra.mrb[2].mxu1 %vm143_vm5, %v313_v54 }
 0x2fa   :  { %v393_v57 = vpop.f32.mrb[2].mxu1 }
 0x2fb   :  { %v394_v58 = vadd.f32 %v511_v56, %v393_v57  ;;  %v566_v59 = vpop.f32.mrb[3].mxu1 }
 0x2fd   :  { %v398_v60 = vsel %vm397_vm8, %v394_v58, 0.0  ;;  %v405_v61 = vmul.f32 %v394_v58, %v394_v58 }
 0x2fe   :  { %v399_v62 = vrot.slane %v398_v60, 4 }
 0x2ff   :  { %v406_v63 = vsel %vm397_vm8, %v405_v61, 0.0 }
 0x300   :  { %v400_v0 = vadd.f32 %v399_v62, %v398_v60  ;;  %v407_v1 = vrot.slane %v406_v63, 4 }
 0x302   :  { %v401_v2 = vrot.slane %v400_v0, 2  ;;  %v408_v3 = vadd.f32 %v407_v1, %v406_v63 }
 0x304   :  { %v402_v5 = vadd.f32 %v401_v2, %v400_v0  ;;  %v409_v6 = vrot.slane %v408_v3, 2 }
 0x306   :  { %v403_v7 = vrot.slane %v402_v5, 1  ;;  %v410_v8 = vadd.f32 %v409_v6, %v408_v3 }
 0x308   :  { %v404_v9 = vadd.f32 %v403_v7, %v402_v5  ;;  %v411_v10 = vrot.slane %v410_v8, 1 }
 0x30a   :  { %v412_v11 = vadd.f32 %v411_v10, %v410_v8  ;;  %v413_v12 = vmul.f32 0.125, %v404_v9 }
 0x30c   :  { %v414_v13 = vmul.f32 0.125, %v412_v11  ;;  %v415_v14 = vmul.f32 %v413_v12, %v413_v12  ;;  %v417_v17 = vsub.f32 %v394_v58, %v413_v12 }
 0x30e   :  { %v416_v15 = vsub.f32 %v414_v13, %v415_v14 }
 0x310   :  { %v418_v16 = vadd.f32 1e-05, %v416_v15 }
 0x312   :  { %607 = vrsqrt.f32 %v418_v16 }
 0x31c   :  { %v608_v18 = vpop.eup %607 }
 0x31d   :  { %v420_v20 = vmul.f32 %v608_v18, %v417_v17 }
 0x31f   :  { %v426_v4 = vmul.f32 %v514_v19, %v420_v20 }
 0x321   :  { %v432_v23 = vadd.f32 %v515_v21, %v426_v4 }
 0x323   :  { %v439_v24 = vmul.f32 %v437_v22, %v432_v23  ;;  %vm434_vm9 = vcmp.ge.f32.partialorder %v432_v23, 0.0 }
 0x325   :  { %v440_v25 = vsel %vm434_vm9, %v432_v23, %v439_v24 }
 0x326   :  { %444 = vperm.xlu0 %599, %v440_v25  }
 0x32a   :  { %600 = vset.pattern.permute.xlu0 %v620_v26 }
 0x32b   :  { %454 = vperm.xlu0 %600, %v440_v25  }
 0x3a5   :  { %v445_v27 = vpop.permute.xlu0 %444 }
 0x3a6   :  { %v451_v31 = vmul.f32 %v516_v28, %v445_v27 }
 0x3aa   :  { %v455_v30 = vpop.permute.xlu0 %454 }
 0x3ab   :  { %v461_v32 = vmul.f32 %v517_v29, %v455_v30 }
 0x3ad   :  { %v462_v34 = vadd.f32 %v461_v32, %v451_v31 }
 0x3af   :  { %v468_v35 = vadd.f32 %v518_v33, %v462_v34 }
 0x3b1   :  { %v469_v36 = vsel %vm397_vm8, %v468_v35, -inf }
 0x3b2   :  { %470 = vmax.xlane.f32.xlu1 %v469_v36 }
 0x43f   :  { %v471_v37 = vpop.xlane.xlu1 %470 }
 0x440   :  { %v472_v38 = vsub.f32 %v468_v35, %v471_v37 }
 0x442   :  { %v473_v39 = vmul.f32 1.442695, %v472_v38 }
 0x444   :  { %609 = vpow2.f32 %v473_v39 }
 0x44e   :  { %v610_v40 = vpop.eup %609 }
 0x44f   :  { %v475_v41 = vsel %vm397_vm8, %v610_v40, 0.0 }
 0x450   :  { %476 = vadd.xlane.f32.xlu1 %v475_v41 }
 0x461   :  { %483 = vrot.lane.b32.xlu1 %v440_v25, %s621_s23 }
 0x4dd   :  { %v477_v42 = vpop.xlane.xlu1 %476 }
 0x4de   :  { %611 = vlog2.f32 %v477_v42 }
 0x4e1   :  { %v484_v48 = vpop.permute.xlu1 %483 }
 0x4e8   :  { %v612_v43 = vpop.eup %611 }
 0x4e9   :  { %v479_v44 = vmul.f32 0.6931472, %v612_v43 }
 0x4eb   :  { %v480_v45 = vsub.f32 %v472_v38, %v479_v44 }
 0x4ed   :  { %v481_v46 = vmul.f32 1.442695, %v480_v45  ;;  %v490_v49 = vsel %vm397_vm8, %v480_v45, %v484_v48 }
 0x4ef   :  { %613 = vpow2.f32 %v481_v46 }
 0x4f9   :  { %v614_v47 = vpop.eup %613 }
 0x4fa   :  { %487 = vrot.lane.b32.xlu0 %v614_v47, %s622_s4 }
 0x56c   :  { %v488_v50 = vpop.permute.xlu0 %487 }
 0x56d   :  { %v492_v51 = vsel %vm491_vm10, %v490_v49, %v488_v50 }
 0x56e   :  { %494 = vst.msk [vmem:[%s785_s5] sm:$0xff] %vm493_vm11, %v492_v51 }

</bundles_post_ra>
